<compile_context>
chip_gen: v5e
topology: v5e:2x2
jax: 0.10.0
libtpu: 0.0.40
codegen_flags: <defaults>
</compile_context>

<pallas_src>
import jax
import jax.numpy as jnp
from jax.experimental import pallas as pl
from jax.experimental.pallas import tpu as pltpu

# Logical (PyTorch) sizes.
F_IN, H1, H2, N_OUT = 392, 200, 100, 2
# Lane-aligned (padded) output sizes per layer.
H1_PAD, H2_PAD, OUT_PAD = 256, 128, 128


def _mlp_kernel(x_ref, w1_ref, b1_ref, w2_ref, b2_ref, w3_ref, b3_ref, o_ref):
    # Cast the raw f32 input tile to bf16 in VMEM (VPU); K stays at 392.
    x = x_ref[...].astype(jnp.bfloat16)
    # Layer 1: Linear + ReLU  (Dropout(0.0) is identity)
    h1 = jnp.dot(x, w1_ref[...], preferred_element_type=jnp.float32)
    h1 = jnp.maximum(h1 + b1_ref[...], 0.0)
    # Layer 2: Linear + ReLU  (Dropout(0.0) is identity)
    h2 = jnp.dot(h1.astype(jnp.bfloat16), w2_ref[...],
                 preferred_element_type=jnp.float32)
    h2 = jnp.maximum(h2 + b2_ref[...], 0.0)
    # Output layer: Linear (no activation); f32 accumulate, bf16 lane-dense store.
    out = jnp.dot(h2.astype(jnp.bfloat16), w3_ref[...],
                  preferred_element_type=jnp.float32)
    o_ref[...] = (out + b3_ref[...]).astype(o_ref.dtype)


def _pad2d(a, rows, cols):
    out = jnp.zeros((rows, cols), a.dtype)
    return out.at[: a.shape[0], : a.shape[1]].set(a)


def prepare_params(params):
    """One-time prep: transpose to (in,out), zero-pad N (and w2/w3 K) to lane-aligned
    sizes, cast weights to bf16.  w1 keeps K=392 (matches the unpadded input)."""
    w1 = _pad2d(params["w1"].T.astype(jnp.float32), F_IN, H1_PAD).astype(jnp.bfloat16)
    w2 = _pad2d(params["w2"].T.astype(jnp.float32), H1_PAD, H2_PAD).astype(jnp.bfloat16)
    w3 = _pad2d(params["w3"].T.astype(jnp.float32), H2_PAD, OUT_PAD).astype(jnp.bfloat16)
    b1 = _pad2d(params["b1"].reshape(1, -1).astype(jnp.float32), 1, H1_PAD)
    b2 = _pad2d(params["b2"].reshape(1, -1).astype(jnp.float32), 1, H2_PAD)
    b3 = _pad2d(params["b3"].reshape(1, -1).astype(jnp.float32), 1, OUT_PAD)
    return (w1, b1, w2, b2, w3, b3)


@jax.jit
def mlp_forward(x_nchw, prepared):
    """Pallas implementation of MLP.forward (digit=False path).

    x_nchw   : (B, C, H, W) float, with C*H*W == 392
    prepared : output of prepare_params(params)
    Returns a list with one (B, 2) f32 array, matching the PyTorch forward.
    """
    w1, b1, w2, b2, w3, b3 = prepared
    B = x_nchw.shape[0]
    x = x_nchw.reshape(B, -1).astype(jnp.float32)   # x.view(x.size(0), -1); no pad/cast pass
    assert x.shape[1] == F_IN

    # Batch tile selection:
    #   * large B: TB = 2048 (long DMAs, per-step overhead amortized; fits the
    #     32 MiB scoped VMEM limit below on all of v5e/v6e/v7x).
    #   * B <= 2*TB: split into (>=) two grid steps so both v7x TensorCores
    #     get work; round up to the 16-row sublane tile.
    TB_MAX = 2048
    if B <= 2 * TB_MAX:
        TB = max(16, ((-(-B // 2)) + 15) // 16 * 16)   # round_up(cdiv(B, 2), 16)
    else:
        TB = TB_MAX
    num_steps = pl.cdiv(B, TB)   # no batch padding: partial last block's extra
                                 # rows are garbage and sliced off below.

    resident = lambda i: (0, 0)                    # weights/biases stay in VMEM
    flops = 2 * B * (F_IN * H1_PAD + H1_PAD * H2_PAD + H2_PAD * OUT_PAD)
    bytes_accessed = (
        B * F_IN * 4                               # x read (f32, unpadded)
        + B * OUT_PAD * 2                          # out write (bf16)
        + (F_IN * H1_PAD + H1_PAD * H2_PAD + H2_PAD * OUT_PAD) * 2   # bf16 weights
        + (H1_PAD + H2_PAD + OUT_PAD) * 4          # f32 biases
    )

    out = pl.pallas_call(
        _mlp_kernel,
        out_shape=jax.ShapeDtypeStruct((B, OUT_PAD), jnp.bfloat16),
        grid=(num_steps,),
        in_specs=[
            pl.BlockSpec((TB, F_IN), lambda i: (i, 0)),      # x tiles, raw f32, streamed
            pl.BlockSpec((F_IN, H1_PAD), resident),          # w1 (392, 256) bf16
            pl.BlockSpec((1, H1_PAD), resident),             # b1
            pl.BlockSpec((H1_PAD, H2_PAD), resident),        # w2 (256, 128) bf16
            pl.BlockSpec((1, H2_PAD), resident),             # b2
            pl.BlockSpec((H2_PAD, OUT_PAD), resident),       # w3 (128, 128) bf16
            pl.BlockSpec((1, OUT_PAD), resident),            # b3
        ],
        out_specs=pl.BlockSpec((TB, OUT_PAD), lambda i: (i, 0)),
        compiler_params=pltpu.CompilerParams(
            dimension_semantics=("parallel",),
            vmem_limit_bytes=32 * 1024 * 1024),
        cost_estimate=pl.CostEstimate(
            flops=flops, transcendentals=0, bytes_accessed=bytes_accessed),
    )(x, w1, b1, w2, b2, w3, b3)

    # Tiny slice of the bf16 slab (128 -> 2 lanes); logits returned as f32.
    return [out[:, :N_OUT].astype(jnp.float32)]


def init_params(key, layers_sizes):
    """Deterministic PyTorch-default-style init: U(-1/sqrt(fan_in), 1/sqrt(fan_in))."""
    params = {}
    for li in range(len(layers_sizes) - 1):
        fan_in, fan_out = layers_sizes[li], layers_sizes[li + 1]
        key, kw, kb = jax.random.split(key, 3)
        bound = 1.0 / (fan_in ** 0.5)
        params[f"w{li + 1}"] = jax.random.uniform(
            kw, (fan_out, fan_in), jnp.float32, -bound, bound)
        params[f"b{li + 1}"] = jax.random.uniform(
            kb, (fan_out,), jnp.float32, -bound, bound)
    return params


def _reference_forward(x_nchw, params):
    """Pure-JAX f32 reference of the PyTorch forward (for a sanity check)."""
    x = x_nchw.reshape(x_nchw.shape[0], -1).astype(jnp.float32)
    h1 = jnp.maximum(x @ params["w1"].T + params["b1"], 0.0)
    h2 = jnp.maximum(h1 @ params["w2"].T + params["b2"], 0.0)
    return h2 @ params["w3"].T + params["b3"]


if __name__ == "__main__":
    # Default module config: MLPBlock([392, 200, 100, 2], [0.0, 0.0])
    layers_sizes = [392, 200, 100, 2]

    key = jax.random.PRNGKey(0)
    key, kx = jax.random.split(key)
    # Input consistent with 392 = 2 * 14 * 14 flattened features (NCHW).
    x = jax.random.normal(kx, (2, 2, 14, 14), jnp.float32)

    params = init_params(key, layers_sizes)
    prepared = prepare_params(params)      # one-time transpose / pad / bf16 cast

    outputs = mlp_forward(x, prepared)
    jax.block_until_ready(outputs[0])

    assert outputs[0].shape == (2, layers_sizes[-1])
    # Loose tolerance: kernel uses bf16 weights/activations with f32 accumulation
    # and a bf16 output store.
    ref = _reference_forward(x, params)
    assert jnp.allclose(outputs[0], ref, rtol=5e-2, atol=5e-2)
    print("KERNEL_OK")
</pallas_src>

<mosaic_0001>
module attributes {stable_mosaic.version = 11 : i64} {
  func.func @_mlp_kernel(%arg0: i32, %arg1: memref<16x392xf32, #tpu.memory_space<vmem>>, %arg2: memref<392x256xbf16, #tpu.memory_space<vmem>>, %arg3: memref<1x256xf32, #tpu.memory_space<vmem>>, %arg4: memref<256x128xbf16, #tpu.memory_space<vmem>>, %arg5: memref<1x128xf32, #tpu.memory_space<vmem>>, %arg6: memref<128x128xbf16, #tpu.memory_space<vmem>>, %arg7: memref<1x128xf32, #tpu.memory_space<vmem>>, %arg8: memref<16x128xbf16, #tpu.memory_space<vmem>>) attributes {dimension_semantics = [#tpu.dimension_semantics<parallel>], iteration_bounds = array<i64: 1>, scalar_prefetch = 0 : i64, scratch_operands = 0 : i64, tpu.core_type = #tpu.core_type<tc>, window_params = [{transform_indices = @transform_0, window_bounds = array<i64: 16, 392>}, {pipeline_mode = #tpu.pipeline_mode<synchronous>, transform_indices = @transform_1, window_bounds = array<i64: 392, 256>}, {pipeline_mode = #tpu.pipeline_mode<synchronous>, transform_indices = @transform_2, window_bounds = array<i64: 1, 256>}, {pipeline_mode = #tpu.pipeline_mode<synchronous>, transform_indices = @transform_3, window_bounds = array<i64: 256, 128>}, {pipeline_mode = #tpu.pipeline_mode<synchronous>, transform_indices = @transform_4, window_bounds = array<i64: 1, 128>}, {pipeline_mode = #tpu.pipeline_mode<synchronous>, transform_indices = @transform_5, window_bounds = array<i64: 128, 128>}, {pipeline_mode = #tpu.pipeline_mode<synchronous>, transform_indices = @transform_6, window_bounds = array<i64: 1, 128>}, {transform_indices = @transform_7, window_bounds = array<i64: 16, 128>}]} {
    %c0 = arith.constant 0 : index
    %c0_0 = arith.constant 0 : index
    %0 = vector.load %arg1[%c0, %c0_0] : memref<16x392xf32, #tpu.memory_space<vmem>>, vector<16x392xf32>
    %1 = arith.truncf %0 : vector<16x392xf32> to vector<16x392xbf16>
    %c0_1 = arith.constant 0 : index
    %c0_2 = arith.constant 0 : index
    %2 = vector.load %arg2[%c0_1, %c0_2] : memref<392x256xbf16, #tpu.memory_space<vmem>>, vector<392x256xbf16>
    %cst = arith.constant dense<0.000000e+00> : vector<16x256xf32>
    %3 = tpu.matmul %1, %2, %cst {dimension_numbers = #tpu.dot_dimension_numbers<[1], [0], [0], [1], [0, 0, 1, 1], [], []>} : vector<16x392xbf16>, vector<392x256xbf16>, vector<16x256xf32> -> vector<16x256xf32>
    %c0_3 = arith.constant 0 : index
    %c0_4 = arith.constant 0 : index
    %4 = vector.load %arg3[%c0_3, %c0_4] : memref<1x256xf32, #tpu.memory_space<vmem>>, vector<1x256xf32>
    %5 = vector.broadcast %4 : vector<1x256xf32> to vector<16x256xf32>
    %6 = arith.addf %3, %5 : vector<16x256xf32>
    %cst_5 = arith.constant 0.000000e+00 : f32
    %7 = vector.broadcast %cst_5 : f32 to vector<16x256xf32>
    %8 = arith.maximumf %6, %7 : vector<16x256xf32>
    %9 = arith.truncf %8 : vector<16x256xf32> to vector<16x256xbf16>
    %c0_6 = arith.constant 0 : index
    %c0_7 = arith.constant 0 : index
    %10 = vector.load %arg4[%c0_6, %c0_7] : memref<256x128xbf16, #tpu.memory_space<vmem>>, vector<256x128xbf16>
    %cst_8 = arith.constant dense<0.000000e+00> : vector<16x128xf32>
    %11 = tpu.matmul %9, %10, %cst_8 {dimension_numbers = #tpu.dot_dimension_numbers<[1], [0], [0], [1], [0, 0, 1, 1], [], []>} : vector<16x256xbf16>, vector<256x128xbf16>, vector<16x128xf32> -> vector<16x128xf32>
    %c0_9 = arith.constant 0 : index
    %c0_10 = arith.constant 0 : index
    %12 = vector.load %arg5[%c0_9, %c0_10] : memref<1x128xf32, #tpu.memory_space<vmem>>, vector<1x128xf32>
    %13 = vector.broadcast %12 : vector<1x128xf32> to vector<16x128xf32>
    %14 = arith.addf %11, %13 : vector<16x128xf32>
    %cst_11 = arith.constant 0.000000e+00 : f32
    %15 = vector.broadcast %cst_11 : f32 to vector<16x128xf32>
    %16 = arith.maximumf %14, %15 : vector<16x128xf32>
    %17 = arith.truncf %16 : vector<16x128xf32> to vector<16x128xbf16>
    %c0_12 = arith.constant 0 : index
    %c0_13 = arith.constant 0 : index
    %18 = vector.load %arg6[%c0_12, %c0_13] : memref<128x128xbf16, #tpu.memory_space<vmem>>, vector<128x128xbf16>
    %cst_14 = arith.constant dense<0.000000e+00> : vector<16x128xf32>
    %19 = tpu.matmul %17, %18, %cst_14 {dimension_numbers = #tpu.dot_dimension_numbers<[1], [0], [0], [1], [0, 0, 1, 1], [], []>} : vector<16x128xbf16>, vector<128x128xbf16>, vector<16x128xf32> -> vector<16x128xf32>
    %c0_15 = arith.constant 0 : index
    %c0_16 = arith.constant 0 : index
    %20 = vector.load %arg7[%c0_15, %c0_16] : memref<1x128xf32, #tpu.memory_space<vmem>>, vector<1x128xf32>
    %21 = vector.broadcast %20 : vector<1x128xf32> to vector<16x128xf32>
    %22 = arith.addf %19, %21 : vector<16x128xf32>
    %23 = arith.truncf %22 : vector<16x128xf32> to vector<16x128xbf16>
    %c0_17 = arith.constant 0 : index
    %c0_18 = arith.constant 0 : index
    %24 = vector.load %arg8[%c0_17, %c0_18] : memref<16x128xbf16, #tpu.memory_space<vmem>>, vector<16x128xbf16>
    tpu.vector_store %arg8[%c0_17, %c0_18], %23 {strides = array<i32>} : memref<16x128xbf16, #tpu.memory_space<vmem>>, vector<16x128xbf16>,
    return
  }
  func.func @transform_0(%arg0: i32) -> (i32, i32) {
    %c0_i32 = arith.constant 0 : i32
    %c0_i32_0 = arith.constant 0 : i32
    return %arg0, %c0_i32 : i32, i32
  }
  func.func @transform_1(%arg0: i32) -> (i32, i32) {
    %c0_i32 = arith.constant 0 : i32
    %c0_i32_0 = arith.constant 0 : i32
    %c0_i32_1 = arith.constant 0 : i32
    return %c0_i32, %c0_i32_0 : i32, i32
  }
  func.func @transform_2(%arg0: i32) -> (i32, i32) {
    %c0_i32 = arith.constant 0 : i32
    %c0_i32_0 = arith.constant 0 : i32
    %c0_i32_1 = arith.constant 0 : i32
    return %c0_i32, %c0_i32_0 : i32, i32
  }
  func.func @transform_3(%arg0: i32) -> (i32, i32) {
    %c0_i32 = arith.constant 0 : i32
    %c0_i32_0 = arith.constant 0 : i32
    %c0_i32_1 = arith.constant 0 : i32
    return %c0_i32, %c0_i32_0 : i32, i32
  }
  func.func @transform_4(%arg0: i32) -> (i32, i32) {
    %c0_i32 = arith.constant 0 : i32
    %c0_i32_0 = arith.constant 0 : i32
    %c0_i32_1 = arith.constant 0 : i32
    return %c0_i32, %c0_i32_0 : i32, i32
  }
  func.func @transform_5(%arg0: i32) -> (i32, i32) {
    %c0_i32 = arith.constant 0 : i32
    %c0_i32_0 = arith.constant 0 : i32
    %c0_i32_1 = arith.constant 0 : i32
    return %c0_i32, %c0_i32_0 : i32, i32
  }
  func.func @transform_6(%arg0: i32) -> (i32, i32) {
    %c0_i32 = arith.constant 0 : i32
    %c0_i32_0 = arith.constant 0 : i32
    %c0_i32_1 = arith.constant 0 : i32
    return %c0_i32, %c0_i32_0 : i32, i32
  }
  func.func @transform_7(%arg0: i32) -> (i32, i32) {
    %c0_i32 = arith.constant 0 : i32
    %c0_i32_0 = arith.constant 0 : i32
    return %arg0, %c0_i32 : i32, i32
  }
}

</mosaic_0001>

<bundles_post_ra>
// kernel: mlp_forward.1
= control target key start
LH: loop header
LB: loop body
LE: loop exit
PB: predicated region body
PF: predicated region fallthrough
CT: control target
= control target key end

     0   :  { %12 = vsyncpa [#allocation3], 0  ;;  %s1466_s0 = inlined_call_operand.vmem [shape: f32[2,392], index: 0, kind: input, shape index: {}]   ;;  %s1467_s1 = inlined_call_operand.hbm [shape: bf16[392,256], index: 1, kind: input, shape index: {}]   ;;  %s1468_s2 = inlined_call_operand.vmem [shape: f32[1,256], index: 2, kind: input, shape index: {}]   ;;  %s1469_s3 = inlined_call_operand.vmem [shape: bf16[256,128], index: 3, kind: input, shape index: {}]   ;;  %s1470_s4 = inlined_call_operand.hbm [shape: f32[1,128], index: 4, kind: input, shape index: {}]   ;;  %s1471_s5 = inlined_call_operand.vmem [shape: bf16[128,128], index: 5, kind: input, shape index: {}]   ;;  %s1472_s6 = inlined_call_operand.vmem [shape: f32[1,128], index: 6, kind: input, shape index: {}]   ;;  %s1473_s7 = inlined_call_operand.vmem [shape: bf16[2,128], index: 7, kind: output, shape index: {}]  }
   0x1   :  { %s20_s26 = sshll.u32 %s1467_s1, 4  ;;  %s21_s26 = int_to_ptr.hbm [resolvable:$true] %s20_s26 }
   0x2   :  { %13 = vsyncpa [#allocation5], 0  ;;  %s1295_s27 = smov [#allocation2]   ;;  %s38_s8 = sshll.u32 %s1470_s4, 4  ;;  %s39_s8 = int_to_ptr.hbm [resolvable:$true] %s38_s8 }
   0x3   :  { %s22_s28 = sshll.u32 %s1295_s27, 4  ;;  %s1296_s9 = smov 128   ;;  %s23_s28 = int_to_ptr.vmem [resolvable:$true] %s22_s28 }
   0x4   :  { %s1297_s10 = smov 8   ;;  %s1298_s11 = smov [#allocation4]  }
   0x5   :  { %28 = dma.hbm_to_vmem [thread:$0]  %s21_s26, 6272, %s23_s28, [#allocation3], %s1296_s9, %s1296_s9, %s1297_s10  }
   0x6   :  { %s40_s12 = sshll.u32 %s1298_s11, 4  ;;  %s41_s12 = int_to_ptr.vmem [resolvable:$true] %s40_s12 }
   0x7   :  { %43 = dma.hbm_to_vmem [thread:$0]  %s39_s8, 16, %s41_s12, [#allocation5]  }
   0x8   :  { %1291 = dma.done.wait [#allocation3], 6272  }
   0x9   :  { %1292 = vsyncadd [#allocation3], 4294961024 }
   0xa   :  { %1293 = dma.done.wait [#allocation5], 16  }
   0xb   :  { %1294 = vsyncadd [#allocation5], 4294967280  ;;  %v933_v0 = vld [vmem:[#allocation2 + $0x70] sm:$0xf]  ;;  %v1180_v1 = vld [vmem:[#allocation2 + $0x74] sm:$0xf0] }
   0xc   :  { %v997_v2 = vld [vmem:[#allocation2 + $0xf0] sm:$0xf]  ;;  %v934_v3 = vor.u32 %v1180_v1, %v933_v0  ;;  %v1196_v4 = vld [vmem:[#allocation2 + $0xf4] sm:$0xf0]  ;;  %v925_v9 = vld [vmem:[#allocation2 + $0x60] sm:$0xf] }
   0xd   :  { %v1061_v5 = vld [vmem:[#allocation2 + $0x170] sm:$0xf]  ;;  %v1212_v6 = vld [vmem:[#allocation2 + $0x174] sm:$0xf0]  ;;  %v998_v7 = vor.u32 %v1196_v4, %v997_v2  ;;  %v1178_v10 = vld [vmem:[#allocation2 + $0x64] sm:$0xf0] }
   0xe   :  { %v1062_v8 = vor.u32 %v1212_v6, %v1061_v5  ;;  %v989_v11 = vld [vmem:[#allocation2 + $0xe0] sm:$0xf]  ;;  %419 = vmatpush.bf16.msra.mxu0 %v934_v3  ;;  %v926_v12 = vor.u32 %v1178_v10, %v925_v9  ;;  %v1194_v13 = vld [vmem:[#allocation2 + $0xe4] sm:$0xf0]  ;;  %v917_v18 = vld [vmem:[#allocation2 + $0x50] sm:$0xf] }
   0xf   :  { %v1053_v14 = vld [vmem:[#allocation2 + $0x160] sm:$0xf]  ;;  %v1210_v15 = vld [vmem:[#allocation2 + $0x164] sm:$0xf0]  ;;  %433 = vmatpush.bf16.msra.mxu1 %v998_v7  ;;  %v990_v16 = vor.u32 %v1194_v13, %v989_v11  ;;  %v1176_v19 = vld [vmem:[#allocation2 + $0x54] sm:$0xf0] }
  0x10   :  { %447 = vmatpush.bf16.msra.mxu2 %v1062_v8  ;;  %v1054_v17 = vor.u32 %v1210_v15, %v1053_v14  ;;  %v981_v20 = vld [vmem:[#allocation2 + $0xd0] sm:$0xf]  ;;  %v1192_v21 = vld [vmem:[#allocation2 + $0xd4] sm:$0xf0]  ;;  %v918_v24 = vor.u32 %v1176_v19, %v917_v18  ;;  %v909_v25 = vld [vmem:[#allocation2 + $0x40] sm:$0xf] }
  0x11   :  { %v1045_v22 = vld [vmem:[#allocation2 + $0x150] sm:$0xf]  ;;  %v1208_v23 = vld [vmem:[#allocation2 + $0x154] sm:$0xf0]  ;;  %v1174_v26 = vld [vmem:[#allocation2 + $0x44] sm:$0xf0]  ;;  %v982_v28 = vor.u32 %v1192_v21, %v981_v20 }
  0x12   :  { %420 = vmatpush.bf16.msra.mxu0 %v926_v12  ;;  %v973_v27 = vld [vmem:[#allocation2 + $0xc0] sm:$0xf]  ;;  %v1046_v29 = vor.u32 %v1208_v23, %v1045_v22  ;;  %v1179_v31 = vld [vmem:[#allocation2 + $0x74] sm:$0xf]  ;;  %v935_v32 = vld [vmem:[#allocation2 + $0x78] sm:$0xf0]  ;;  %v910_v37 = vor.u32 %v1174_v26, %v909_v25 }
  0x13   :  { %434 = vmatpush.bf16.msra.mxu1 %v990_v16  ;;  %v1345_v30 = vld [vmem:[#allocation2 + $0x180] sm:$0xff]  ;;  %v1190_v33 = vld [vmem:[#allocation2 + $0xc4] sm:$0xf0]  ;;  %vm412_vm0 = vcmask 1043456   ;;  %v938_v39 = vor.u32 %v1179_v31, %v935_v32  ;;  %v901_v40 = vld [vmem:[#allocation2 + $0x30] sm:$0xf] }
  0x14   :  { %448 = vmatpush.bf16.msra.mxu2 %v1054_v17  ;;  %v1037_v34 = vld [vmem:[#allocation2 + $0x140] sm:$0xf]  ;;  %v1206_v35 = vld [vmem:[#allocation2 + $0x144] sm:$0xf0]  ;;  %v308_v36 = vunpack.c.l.b16 %v1345_v30  ;;  %v1172_v41 = vld [vmem:[#allocation2 + $0x34] sm:$0xf0]  ;;  %v974_v43 = vor.u32 %v1190_v33, %v973_v27  ;;  %v309_v20 = vunpack.c.h.b16 %v1345_v30 }
  0x15   :  { %v965_v42 = vld [vmem:[#allocation2 + $0xb0] sm:$0xf]  ;;  %v1038_v44 = vor.u32 %v1206_v35, %v1037_v34  ;;  %v1188_v45 = vld [vmem:[#allocation2 + $0xb4] sm:$0xf0]  ;;  %v1177_v46 = vld [vmem:[#allocation2 + $0x64] sm:$0xf]  ;;  %v902_v51 = vor.u32 %v1172_v41, %v901_v40 }
  0x16   :  { %421 = vmatpush.bf16.msra.mxu0 %v918_v24  ;;  %v358_v38 = vpack.c.b16 %v308_v36, %v308_v36  ;;  %v927_v47 = vld [vmem:[#allocation2 + $0x68] sm:$0xf0]  ;;  %v1029_v49 = vld [vmem:[#allocation2 + $0x130] sm:$0xf]  ;;  %v1204_v50 = vld [vmem:[#allocation2 + $0x134] sm:$0xf0]  ;;  %v966_v56 = vor.u32 %v1188_v45, %v965_v42  ;;  %v359_v36 = vpack.c.b16 %v309_v20, %v309_v20 }
  0x17   :  { %435 = vmatpush.bf16.msra.mxu1 %v982_v28  ;;  %v930_v52 = vor.u32 %v1177_v46, %v927_v47  ;;  %v893_v53 = vld [vmem:[#allocation2 + $0x20] sm:$0xf]  ;;  %v1170_v54 = vld [vmem:[#allocation2 + $0x24] sm:$0xf0]  ;;  %v1030_v57 = vor.u32 %v1204_v50, %v1029_v49  ;;  %v1175_v58 = vld [vmem:[#allocation2 + $0x54] sm:$0xf] }
  0x18   :  { %449 = vmatpush.bf16.msra.mxu2 %v1046_v29  ;;  %v414_v48 = vsel %vm412_vm0, %v358_v38, 0  ;;  %v957_v55 = vld [vmem:[#allocation2 + $0xa0] sm:$0xf]  ;;  %v919_v59 = vld [vmem:[#allocation2 + $0x58] sm:$0xf0]  ;;  %v894_v2 = vor.u32 %v1170_v54, %v893_v53  ;;  %v59_v9 = vld [vmem:[%s1466_s0 + $0x10] sm:$0xff] }
  0x19   :  { %468 = vmatpush.bf16.msra.mxu3 %v414_v48  ;;  %v57_v60 = vld [vmem:[%s1466_s0] sm:$0xff]  ;;  %v1186_v61 = vld [vmem:[#allocation2 + $0xa4] sm:$0xf0]  ;;  %v1021_v62 = vld [vmem:[#allocation2 + $0x120] sm:$0xf]  ;;  %v922_v3 = vor.u32 %v1175_v58, %v919_v59  ;;  %vm408_vm1 = vcmask 64512  }
  0x1a   :  { %422 = vmatpush.bf16.msra.mxu0 %v910_v37  ;;  %v1202_v63 = vld [vmem:[#allocation2 + $0x124] sm:$0xf0]  ;;  %v885_v0 = vld [vmem:[#allocation2 + $0x10] sm:$0xf]  ;;  %v1168_v1 = vld [vmem:[#allocation2 + $0x14] sm:$0xf0]  ;;  %v958_v10 = vor.u32 %v1186_v61, %v957_v55 }
  0x1b   :  { %436 = vmatpush.bf16.msra.mxu1 %v974_v43  ;;  %v949_v4 = vld [vmem:[#allocation2 + $0x90] sm:$0xf]  ;;  %v1184_v5 = vld [vmem:[#allocation2 + $0x94] sm:$0xf0]  ;;  %v1173_v7 = vld [vmem:[#allocation2 + $0x44] sm:$0xf]  ;;  %v1022_v11 = vor.u32 %v1202_v63, %v1021_v62  ;;  %v886_v21 = vor.u32 %v1168_v1, %v885_v0 }
  0x1c   :  { %450 = vmatpush.bf16.msra.mxu2 %v1038_v44  ;;  %v1013_v6 = vld [vmem:[#allocation2 + $0x110] sm:$0xf]  ;;  %v58_v8 = vld [vmem:[%s1466_s0 + $0x8] sm:$0xff]  ;;  %73 = vst [vmem:[#allocation1] ss:$4 sm:$0xff] %v57_v60  ;;  %v61_v14 = vld [vmem:[%s1466_s0 + $0x20] sm:$0xff]  ;;  %v950_v28 = vor.u32 %v1184_v5, %v949_v4 }
  0x1d   :  { %475 = vmatpush.bf16.msrb.mxu3 %v938_v39  ;;  %v911_v12 = vld [vmem:[#allocation2 + $0x48] sm:$0xf0]  ;;  %v60_v13 = vld [vmem:[%s1466_s0 + $0x18] sm:$0xff]  ;;  %75 = vst [vmem:[#allocation1 + $0x1] ss:$4 sm:$0xff] %v58_v8  ;;  %v62_v16 = vld [vmem:[%s1466_s0 + $0x28] sm:$0xff] }
  0x1e   :  { %423 = vmatpush.bf16.msra.mxu0 %v902_v51  ;;  %v1200_v15 = vld [vmem:[#allocation2 + $0x114] sm:$0xf0]  ;;  %77 = vst [vmem:[#allocation1 + $0x2] ss:$4 sm:$0xff] %v59_v9  ;;  %v877_v17 = vld [vmem:[#allocation2] sm:$0xf]  ;;  %v914_v22 = vor.u32 %v1173_v7, %v911_v12 }
  0x1f   :  { %437 = vmatpush.bf16.msra.mxu1 %v966_v56  ;;  %v1166_v18 = vld [vmem:[#allocation2 + $0x4] sm:$0xf0]  ;;  %79 = vst [vmem:[#allocation1 + $0x3] ss:$4 sm:$0xff] %v60_v13  ;;  %v941_v23 = vld [vmem:[#allocation2 + $0x80] sm:$0xf]  ;;  %v1014_v29 = vor.u32 %v1200_v15, %v1013_v6 }
  0x20   :  { %451 = vmatpush.bf16.msra.mxu2 %v1030_v57  ;;  %v63_v19 = vld [vmem:[%s1466_s0 + $0x30] sm:$0xff]  ;;  %v1005_v25 = vld [vmem:[#allocation2 + $0x100] sm:$0xf]  ;;  %v64_v27 = vld [vmem:[%s1466_s0 + $0x38] sm:$0xff]  ;;  %81 = vst [vmem:[#allocation1 + $0x20] ss:$4 sm:$0xff] %v61_v14  ;;  %v878_v37 = vor.u32 %v1166_v18, %v877_v17 }
  0x21   :  { %476 = vmatpush.bf16.msrb.mxu3 %v930_v52  ;;  %v1182_v24 = vld [vmem:[#allocation2 + $0x84] sm:$0xf0]  ;;  %83 = vst [vmem:[#allocation1 + $0x21] ss:$4 sm:$0xff] %v62_v16  ;;  %v1171_v31 = vld [vmem:[#allocation2 + $0x34] sm:$0xf] }
  0x22   :  { %424 = vmatpush.bf16.msra.mxu0 %v894_v2  ;;  %v1198_v26 = vld [vmem:[#allocation2 + $0x104] sm:$0xf0]  ;;  %v903_v30 = vld [vmem:[#allocation2 + $0x38] sm:$0xf0]  ;;  %85 = vst [vmem:[#allocation1 + $0x22] ss:$4 sm:$0xff] %v63_v19  ;;  %v942_v39 = vor.u32 %v1182_v24, %v941_v23 }
  0x23   :  { %438 = vmatpush.bf16.msra.mxu1 %v958_v10  ;;  %v1195_v32 = vld [vmem:[#allocation2 + $0xf4] sm:$0xf]  ;;  %v999_v33 = vld [vmem:[#allocation2 + $0xf8] sm:$0xf0]  ;;  %87 = vst [vmem:[#allocation1 + $0x23] ss:$4 sm:$0xff] %v64_v27  ;;  %v906_v38 = vor.u32 %v1171_v31, %v903_v30  ;;  %v1006_v40 = vor.u32 %v1198_v26, %v1005_v25 }
  0x24   :  { %452 = vmatpush.bf16.msra.mxu2 %v1022_v11  ;;  %v1211_v34 = vld [vmem:[#allocation2 + $0x174] sm:$0xf]  ;;  %v1063_v35 = vld [vmem:[#allocation2 + $0x178] sm:$0xf0]  ;;  %v1169_v41 = vld [vmem:[#allocation2 + $0x24] sm:$0xf]  ;;  %v1002_v43 = vor.u32 %v1195_v32, %v999_v33 }
  0x25   :  { %477 = vmatpush.bf16.msrb.mxu3 %v922_v3  ;;  %v895_v42 = vld [vmem:[#allocation2 + $0x28] sm:$0xf0]  ;;  %v1066_v44 = vor.u32 %v1211_v34, %v1063_v35  ;;  %v1193_v45 = vld [vmem:[#allocation2 + $0xe4] sm:$0xf]  ;;  %v1167_v50 = vld [vmem:[#allocation2 + $0x14] sm:$0xf] }
  0x26   :  { %425 = vmatpush.bf16.msra.mxu0 %v886_v21  ;;  %v991_v46 = vld [vmem:[#allocation2 + $0xe8] sm:$0xf0]  ;;  %v1209_v47 = vld [vmem:[#allocation2 + $0x164] sm:$0xf]  ;;  %v887_v51 = vld [vmem:[#allocation2 + $0x18] sm:$0xf0]  ;;  %v898_v55 = vor.u32 %v1169_v41, %v895_v42 }
  0x27   :  { %439 = vmatpush.bf16.msra.mxu1 %v950_v28  ;;  %v1055_v48 = vld [vmem:[#allocation2 + $0x168] sm:$0xf0]  ;;  %v91_v49 = vld.sshfl [vmem:[#allocation1 + $0x18] sm:$0xff pattern:$0x73625140]  ;;  %v417_v52 = vsel %vm412_vm0, %v359_v36, 0  ;;  %v994_v1 = vor.u32 %v1193_v45, %v991_v46  ;;  %v890_v5 = vor.u32 %v1167_v50, %v887_v51 }
  0x28   :  { %453 = vmatpush.bf16.msra.mxu2 %v1014_v29  ;;  %v90_v53 = vld.sshfl [vmem:[#allocation1 + $0x10] sm:$0xff pattern:$0x73625140]  ;;  %v88_v54 = vld.sshfl [vmem:[#allocation1] sm:$0xff pattern:$0x73625140]  ;;  %v1058_v61 = vor.u32 %v1209_v47, %v1055_v48 }
  0x29   :  { %478 = vmatpush.bf16.msrb.mxu3 %v914_v22  ;;  %v89_v56 = vld.sshfl [vmem:[#allocation1 + $0x8] sm:$0xff pattern:$0x73625140]  ;;  %v1207_v57 = vld [vmem:[#allocation2 + $0x154] sm:$0xf]  ;;  %v1219_v24 = vld [vmem:[%s1469_s3 + $0x30] sm:$0xff] }
  0x2a   :  { %426 = vmatpush.bf16.msra.mxu0 %v878_v37  ;;  %v1047_v58 = vld [vmem:[#allocation2 + $0x158] sm:$0xf0]  ;;  %v95_v59 = vld.sshfl [vmem:[#allocation1 + $0x38] sm:$0xff pattern:$0x73625140]  ;;  %v1218_v32 = vld [vmem:[%s1469_s3 + $0x28] sm:$0xff] }
  0x2b   :  { %440 = vmatpush.bf16.msra.mxu1 %v942_v39  ;;  %v94_v60 = vld.sshfl [vmem:[#allocation1 + $0x30] sm:$0xff pattern:$0x73625140]  ;;  %v107_v62 = vpack.c.bf16 %v95_v59, %v91_v49  ;;  %v92_v0 = vld.sshfl [vmem:[#allocation1 + $0x20] sm:$0xff pattern:$0x73625140]  ;;  %v1050_v10 = vor.u32 %v1207_v57, %v1047_v58 }
  0x2c   :  { %454 = vmatpush.bf16.msra.mxu2 %v1006_v40  ;;  %v1375_v63 = vpack.c.bf16 %v94_v60, %v90_v53  ;;  %v93_v2 = vld.sshfl [vmem:[#allocation1 + $0x28] sm:$0xff pattern:$0x73625140]  ;;  %v104_v3 = vpack.c.bf16 %v92_v0, %v88_v54  ;;  %v1191_v6 = vld [vmem:[#allocation2 + $0xd4] sm:$0xf]  ;;  %v1217_v46 = vld [vmem:[%s1469_s3 + $0x20] sm:$0xff] }
  0x2d   :  { %479 = vmatpush.bf16.msrb.mxu3 %v906_v38  ;;  %v1377_v4 = vpack.c.bf16 %v93_v2, %v89_v56  ;;  %v983_v7 = vld [vmem:[#allocation2 + $0xd8] sm:$0xf0]  ;;  %v1165_v8 = vld [vmem:[#allocation2 + $0x4] sm:$0xf]  ;;  %v879_v9 = vld [vmem:[#allocation2 + $0x8] sm:$0xf0] }
  0x2e   :  { %489 = vmatpush.bf16.msrb.mxu0 %v1002_v43  ;;  %1067 = vmatmul.msk.bf16.vlgmr.msra.gmra.mxu3 %vm408_vm1, %v107_v62  ;;  %v986_v11 = vor.u32 %v1191_v6, %v983_v7  ;;  %v1205_v12 = vld [vmem:[#allocation2 + $0x144] sm:$0xf]  ;;  %v1039_v13 = vld [vmem:[#allocation2 + $0x148] sm:$0xf0]  ;;  %v882_v14 = vor.u32 %v1165_v8, %v879_v9  ;;  %v1220_v17 = vld [vmem:[%s1469_s3 + $0x38] sm:$0xff]  ;;  %vm788_vm2 = vcmask 1040384  }
  0x2f   :  { %503 = vmatpush.bf16.msrb.mxu1 %v1066_v44  ;;  %455 = vmatmul.bf16.vlgmr.msra.gmra.mxu2 %v1375_v63  ;;  %v1189_v15 = vld [vmem:[#allocation2 + $0xc4] sm:$0xf]  ;;  %v975_v16 = vld [vmem:[#allocation2 + $0xc8] sm:$0xf0]  ;;  %v1042_v18 = vor.u32 %v1205_v12, %v1039_v13  ;;  %v1203_v19 = vld [vmem:[#allocation2 + $0x134] sm:$0xf] }
  0x30   :  { %524 = vmatpush.bf16.msrb.mxu2 %v417_v52  ;;  %427 = vmatmul.bf16.vlgmr.msra.gmra.mxu0 %v104_v3  ;;  %v978_v20 = vor.u32 %v1189_v15, %v975_v16  ;;  %v1031_v21 = vld [vmem:[#allocation2 + $0x138] sm:$0xf0]  ;;  %v1187_v22 = vld [vmem:[#allocation2 + $0xb4] sm:$0xf]  ;;  %v1201_v27 = vld [vmem:[#allocation2 + $0x124] sm:$0xf] }
  0x31   :  { %480 = vmatpush.bf16.msrb.mxu3 %v898_v55  ;;  %441 = vmatmul.bf16.vlgmr.msra.gmra.mxu1 %v1377_v4  ;;  %v967_v23 = vld [vmem:[#allocation2 + $0xb8] sm:$0xf0]  ;;  %v1034_v25 = vor.u32 %v1203_v19, %v1031_v21  ;;  %v1023_v28 = vld [vmem:[#allocation2 + $0x128] sm:$0xf0]  ;;  %v1185_v29 = vld [vmem:[#allocation2 + $0xa4] sm:$0xf] }
  0x32   :  { %490 = vmatpush.bf16.msrb.mxu0 %v994_v1  ;;  %v970_v26 = vor.u32 %v1187_v22, %v967_v23  ;;  %v959_v31 = vld [vmem:[#allocation2 + $0xa8] sm:$0xf0]  ;;  %v1026_v30 = vor.u32 %v1201_v27, %v1023_v28  ;;  %v1199_v34 = vld [vmem:[#allocation2 + $0x114] sm:$0xf]  ;;  %v1015_v35 = vld [vmem:[#allocation2 + $0x118] sm:$0xf0] }
  0x33   :  { %504 = vmatpush.bf16.msrb.mxu1 %v1058_v61  ;;  %v962_v33 = vor.u32 %v1185_v29, %v959_v31  ;;  %v1183_v36 = vld [vmem:[#allocation2 + $0x94] sm:$0xf]  ;;  %v951_v37 = vld [vmem:[#allocation2 + $0x98] sm:$0xf0]  ;;  %v1018_v38 = vor.u32 %v1199_v34, %v1015_v35  ;;  %v1197_v40 = vld [vmem:[#allocation2 + $0x104] sm:$0xf] }
  0x34   :  { %v954_v39 = vor.u32 %v1183_v36, %v951_v37  ;;  %v1007_v41 = vld [vmem:[#allocation2 + $0x108] sm:$0xf0]  ;;  %v1181_v42 = vld [vmem:[#allocation2 + $0x84] sm:$0xf]  ;;  %v1216_v47 = vld [vmem:[%s1469_s3 + $0x18] sm:$0xff] }
  0x35   :  { %481 = vmatpush.bf16.msrb.mxu3 %v890_v5  ;;  %v943_v43 = vld [vmem:[#allocation2 + $0x88] sm:$0xf0]  ;;  %v1010_v44 = vor.u32 %v1197_v40, %v1007_v41  ;;  %v1214_v49 = vld [vmem:[%s1469_s3 + $0x8] sm:$0xff]  ;;  %v1228_v50 = vld [vmem:[%s1469_s3 + $0x78] sm:$0xff] }
  0x36   :  { %491 = vmatpush.bf16.msrb.mxu0 %v986_v11  ;;  %v946_v45 = vor.u32 %v1181_v42, %v943_v43  ;;  %v1215_v48 = vld [vmem:[%s1469_s3 + $0x10] sm:$0xff]  ;;  %683 = vmatpush.bf16.msra.mxu2 %v1228_v50  ;;  %v1213_v51 = vld [vmem:[%s1469_s3] sm:$0xff]  ;;  %v1226_v53 = vld [vmem:[%s1469_s3 + $0x68] sm:$0xff] }
  0x37   :  { %505 = vmatpush.bf16.msrb.mxu1 %v1050_v10  ;;  %v1227_v52 = vld [vmem:[%s1469_s3 + $0x70] sm:$0xff]  ;;  %v157_v54 = vld [vmem:[%s1468_s2] sm:$0x3]  ;;  %v1224_v59 = vld [vmem:[%s1469_s3 + $0x58] sm:$0xff] }
  0x38   :  { %v1225_v55 = vld [vmem:[%s1469_s3 + $0x60] sm:$0xff]  ;;  %v159_v56 = vperm.slane %v157_v54, 0  ;;  %v1236_v36 = vld [vmem:[%s1471_s5 + $0x38] sm:$0xff]  ;;  %v1235_v37 = vld [vmem:[%s1471_s5 + $0x30] sm:$0xff] }
  0x39   :  { %482 = vmatpush.bf16.msrb.mxu3 %v882_v14  ;;  %v1221_v9 = vld [vmem:[%s1469_s3 + $0x40] sm:$0xff]  ;;  %v1232_v40 = vld [vmem:[%s1471_s5 + $0x18] sm:$0xff]  ;;  %v1231_v41 = vld [vmem:[%s1471_s5 + $0x10] sm:$0xff] }
  0x3a   :  { %492 = vmatpush.bf16.msrb.mxu0 %v978_v20  ;;  %684 = vmatpush.bf16.msra.mxu2 %v1227_v52  ;;  %v1230_v42 = vld [vmem:[%s1471_s5 + $0x8] sm:$0xff]  ;;  %v1229_v43 = vld [vmem:[%s1471_s5] sm:$0xff] }
  0x3b   :  { %506 = vmatpush.bf16.msrb.mxu1 %v1042_v18 }
  0x3d   :  { %669 = vmatpush.bf16.msra.mxu3 %v1220_v17  ;;  %v160_v17 = vperm.slane %v157_v54, 1 }
  0x3e   :  { %493 = vmatpush.bf16.msrb.mxu0 %v970_v26  ;;  %483 = vmatmul.bf16.vlgmr.msrb.gmra.mxu3 %v104_v3 }
  0x3f   :  { %507 = vmatpush.bf16.msrb.mxu1 %v1034_v25  ;;  %1068 = vmatmul.msk.bf16.vlgmr.msrb.gmra.mxu2 %vm408_vm1, %v107_v62 }
  0x40   :  { %685 = vmatpush.bf16.msra.mxu2 %v1226_v53 }
  0x41   :  { %670 = vmatpush.bf16.msra.mxu3 %v1219_v24 }
  0x42   :  { %494 = vmatpush.bf16.msrb.mxu0 %v962_v33 }
  0x43   :  { %508 = vmatpush.bf16.msrb.mxu1 %v1026_v30 }
  0x44   :  { %686 = vmatpush.bf16.msra.mxu2 %v1225_v55 }
  0x45   :  { %671 = vmatpush.bf16.msra.mxu3 %v1218_v32 }
  0x46   :  { %495 = vmatpush.bf16.msrb.mxu0 %v954_v39  ;;  %v1233_v39 = vld [vmem:[%s1471_s5 + $0x20] sm:$0xff] }
  0x47   :  { %509 = vmatpush.bf16.msrb.mxu1 %v1018_v38  ;;  %v1234_v38 = vld [vmem:[%s1471_s5 + $0x28] sm:$0xff] }
  0x48   :  { %687 = vmatpush.bf16.msra.mxu2 %v1224_v59 }
  0x49   :  { %672 = vmatpush.bf16.msra.mxu3 %v1217_v46  ;;  %v1241_v46 = vld [vmem:[#allocation4] ss:$0 sm:$0xff] }
  0x4a   :  { %496 = vmatpush.bf16.msrb.mxu0 %v946_v45 }
  0x4b   :  { %510 = vmatpush.bf16.msrb.mxu1 %v1010_v44 }
  0x4d   :  { %497 = vmatmul.bf16.vlgmr.msrb.gmra.mxu0 %v1377_v4  ;;  %673 = vmatpush.bf16.msra.mxu3 %v1216_v47  ;;  %v1222_v4 = vld [vmem:[%s1469_s3 + $0x48] sm:$0xff] }
  0x4e   :  { %511 = vmatmul.bf16.vlgmr.msrb.gmra.mxu1 %v1375_v63  ;;  %v1223_v63 = vld [vmem:[%s1469_s3 + $0x50] sm:$0xff]  ;;  %768 = vmatpush.bf16.msra.mxu0 %v1236_v36 }
  0x4f   :  { %688 = vmatpush.bf16.msra.mxu2 %v1223_v63 }
  0x51   :  { %674 = vmatpush.bf16.msra.mxu3 %v1215_v48 }
  0x52   :  { %769 = vmatpush.bf16.msra.mxu0 %v1235_v37 }
  0x53   :  { %689 = vmatpush.bf16.msra.mxu2 %v1222_v4 }
  0x55   :  { %675 = vmatpush.bf16.msra.mxu3 %v1214_v49 }
  0x56   :  { %770 = vmatpush.bf16.msra.mxu0 %v1234_v38 }
  0x57   :  { %690 = vmatpush.bf16.msra.mxu2 %v1221_v9 }
  0x59   :  { %676 = vmatpush.bf16.msra.mxu3 %v1213_v51 }
  0x5a   :  { %771 = vmatpush.bf16.msra.mxu0 %v1233_v39 }
  0x5e   :  { %772 = vmatpush.bf16.msra.mxu0 %v1232_v40 }
  0x62   :  { %773 = vmatpush.bf16.msra.mxu0 %v1231_v41 }
  0x66   :  { %774 = vmatpush.bf16.msra.mxu0 %v1230_v42 }
  0x6a   :  { %775 = vmatpush.bf16.msra.mxu0 %v1229_v43 }
  0xad   :  { %v428_v57 = vpop.f32.mrf.mxu0 }
  0xae   :  { %v442_v58 = vpop.f32.mrf.mxu1  ;;  %v429_v60 = vadd.f32 %v428_v57, %v159_v56 }
  0xb0   :  { %v443_v0 = vadd.f32 %v442_v58, %v429_v60 }
  0xb1   :  { %v470_v61 = vpop.f32.mrf.mxu3 }
  0xb2   :  { %v456_v62 = vpop.f32.mrf.mxu2 }
  0xb3   :  { %v457_v5 = vadd.f32 %v456_v62, %v443_v0 }
  0xb5   :  { %v430_v1 = vpop.f32.mrf.mxu0  ;;  %v471_v10 = vadd.f32 %v470_v61, %v457_v5 }
  0xb6   :  { %v431_v2 = vadd.f32 %v430_v1, %v159_v56  ;;  %v444_v3 = vpop.f32.mrf.mxu1  ;;  %v1242_v56 = vld [vmem:[%s1472_s6] ss:$0 sm:$0xff] }
  0xb7   :  { %v531_v13 = vmax.f32 %v471_v10, 0.0 }
  0xb8   :  { %v445_v6 = vadd.f32 %v444_v3, %v431_v2 }
  0xb9   :  { %v472_v7 = vpop.f32.mrf.mxu3 }
  0xba   :  { %v458_v8 = vpop.f32.mrf.mxu2 }
  0xbb   :  { %v459_v11 = vadd.f32 %v458_v8, %v445_v6 }
  0xbd   :  { %v473_v12 = vadd.f32 %v472_v7, %v459_v11 }
  0xbf   :  { %v533_v14 = vmax.f32 %v473_v12, 0.0 }
  0xc1   :  { %v535_v15 = vpack.c.bf16 %v533_v14, %v531_v13  ;;  %v484_v16 = vpop.f32.mrf.mxu3 }
  0xc2   :  { %v485_v18 = vadd.f32 %v484_v16, %v160_v17  ;;  %v526_v21 = vpop.f32.mrf.mxu2 }
  0xc3   :  { %677 = vmatmul.bf16.vlgmr.msra.gmra.mxu3 %v535_v15 }
  0xc9   :  { %v486_v23 = vpop.f32.mrf.mxu3 }
  0xca   :  { %v498_v19 = vpop.f32.mrf.mxu0  ;;  %v487_v24 = vadd.f32 %v486_v23, %v160_v17  ;;  %v528_v30 = vpop.f32.mrf.mxu2 }
  0xcb   :  { %v512_v20 = vpop.f32.mrf.mxu1  ;;  %v499_v22 = vadd.f32 %v498_v19, %v485_v18 }
  0xcd   :  { %v513_v25 = vadd.f32 %v512_v20, %v499_v22 }
  0xcf   :  { %v527_v29 = vadd.f32 %v526_v21, %v513_v25 }
  0xd1   :  { %v532_v33 = vmax.f32 %v527_v29, 0.0 }
  0xd2   :  { %v500_v26 = vpop.f32.mrf.mxu0 }
  0xd3   :  { %v501_v27 = vadd.f32 %v500_v26, %v487_v24  ;;  %v514_v28 = vpop.f32.mrf.mxu1 }
  0xd5   :  { %v515_v31 = vadd.f32 %v514_v28, %v501_v27 }
  0xd7   :  { %v529_v32 = vadd.f32 %v528_v30, %v515_v31 }
  0xd9   :  { %v534_v34 = vmax.f32 %v529_v32, 0.0 }
  0xdb   :  { %v536_v35 = vpack.c.bf16 %v534_v34, %v532_v33 }
  0xdd   :  { %691 = vmatmul.bf16.vlgmr.msra.gmra.mxu2 %v536_v35 }
 0x146   :  { %v678_v44 = vpop.f32.mrf.mxu3 }
 0x147   :  { %v679_v48 = vadd.f32 %v1241_v46, %v678_v44 }
 0x14e   :  { %v680_v47 = vpop.f32.mrf.mxu3 }
 0x14f   :  { %v681_v49 = vadd.f32 %v1241_v46, %v680_v47 }
 0x160   :  { %v692_v45 = vpop.f32.mrf.mxu2 }
 0x161   :  { %v693_v50 = vadd.f32 %v692_v45, %v679_v48 }
 0x163   :  { %v697_v53 = vmax.f32 %v693_v50, 0.0 }
 0x168   :  { %v694_v51 = vpop.f32.mrf.mxu2 }
 0x169   :  { %v695_v52 = vadd.f32 %v694_v51, %v681_v49 }
 0x16b   :  { %v698_v54 = vmax.f32 %v695_v52, 0.0 }
 0x16d   :  { %v699_v55 = vpack.c.bf16 %v698_v54, %v697_v53 }
 0x16f   :  { %776 = vmatmul.bf16.vlgmr.msra.gmra.mxu0 %v699_v55 }
 0x1ec   :  { %v777_v57 = vpop.f32.mrf.mxu0 }
 0x1ed   :  { %v778_v58 = vadd.f32 %v1242_v56, %v777_v57 }
 0x1ef   :  { %v782_v59 = vpack.c.bf16 %v778_v58, %v778_v58 }
 0x1f1   :  { %v786_v60 = vrot.slane %v782_v59, 3 }
 0x1f3   :  { %v791_v61 = vsel %vm788_vm2, %v782_v59, %v786_v60 }
 0x1f4   :  { %824 = vst [vmem:[#allocation6] sm:$0x1] %v791_v61  ;;  %v779_v62 = vpop.f32.mrf.mxu0 }
 0x1fb   :  { %v850_v63 = vld [vmem:[#allocation6] sm:$0x1] }
 0x1fc   :  { %851 = vst [vmem:[%s1473_s7] sm:$0x1] %v850_v63 }
 0x1fd   :  { %869 = vsyncpa [#allocation3], 1 }
 0x1fe   :  { %870 = vsyncpa [#allocation5], 1 }

</bundles_post_ra>
